<compile_context>
chip_gen: v6e
topology: v6e:2x2x1
jax: 0.10.0
libtpu: 0.0.40
codegen_flags: <defaults>
</compile_context>

<pallas_src>
import math

import jax
import jax.numpy as jnp
from jax.experimental import pallas as pl
from jax.experimental.pallas import tpu as pltpu

MAX_TILE_N = 8192        # lane-tile cap (multiple of 128)
PROWS, PCOLS = 72, 128   # packed parameter slab (sublane/lane aligned)
# slab row map (skinny params replicated across all 128 lanes):
#   rows  0: 8  w1      rows  8:16  b1
#   rows 16:32  w2 (cols 0:8, not replicated)
#   rows 32:48  b2      rows 48:64  w3      row 64  b3


def mlp_kernel(p_ref, x_ref, o_ref):
    x = x_ref[...]                       # (1, T): batch on lanes
    T = x.shape[1]                       # static
    rep = (T == PCOLS)                   # lane-replicated params line up exactly

    def param(r0, r1):
        return p_ref[r0:r1, :] if rep else p_ref[r0:r1, 0:1]

    w1 = param(0, 8)                     # (8,T) or (8,1)
    b1 = param(8, 16)
    w2 = p_ref[16:32, 0:8]               # (16, 8)  hidden2 weight (MXU lhs)
    b2 = param(32, 48)
    w3 = param(48, 64)
    b3 = param(64, 65)

    # Layer 1 (1 -> 8): K == 1 outer product -> VPU FMA, stays off the MXU.
    h1 = jnp.maximum(w1 * x + b1, 0.0)                        # (8, T)

    # Layer 2 (8 -> 16): the one real matmul (MXU), f32 accumulation.
    h2 = jnp.dot(w2, h1, preferred_element_type=jnp.float32) + b2
    h2 = jnp.maximum(h2, 0.0)                                 # (16, T)

    # Layer 3 (16 -> 1): N_out == 1 -> elementwise mul + sublane reduce (XLU).
    # (An MXU mat-vec variant was considered per review; kept on VPU/XLU —
    #  the MXU slot is idle either way and the reduce is exact f32.)
    out = jnp.sum(w3 * h2, axis=0, keepdims=True) + b3        # (1, T)
    o_ref[...] = out.astype(o_ref.dtype)


def pack_params(params):
    """Pack PyTorch-layout tensors into one lane-replicated (72,128) slab."""
    w1, b1, w2, b2, w3, b3 = params      # w: (out, in), b: (out,)
    rep = lambda v: jnp.broadcast_to(v[:, None].astype(jnp.float32),
                                     (v.shape[0], PCOLS))
    slab = jnp.zeros((PROWS, PCOLS), jnp.float32)
    slab = slab.at[0:8, :].set(rep(w1[:, 0]))     # w1 column, replicated
    slab = slab.at[8:16, :].set(rep(b1))
    slab = slab.at[16:32, 0:8].set(w2.astype(jnp.float32))
    slab = slab.at[32:48, :].set(rep(b2))
    slab = slab.at[48:64, :].set(rep(w3[0, :]))   # w3 row, replicated
    slab = slab.at[64, :].set(b3[0].astype(jnp.float32))
    return slab


def _choose_tile(n):
    """Lane-tile size: single tile for small n; >=2 balanced tiles for large n
    (so the 'parallel' grid axis engages both v7x TensorCores)."""
    n_lane = 128 * pl.cdiv(n, 128)
    if n_lane <= MAX_TILE_N:
        return n_lane                    # one step; splitting tiny work is pure overhead
    steps = pl.cdiv(n_lane, MAX_TILE_N)
    return 128 * pl.cdiv(pl.cdiv(n_lane, steps), 128)


@jax.jit
def mlp_forward(x, slab):
    """x: (n, 1) PyTorch-style column; returns (n, 1)."""
    n = x.shape[0]
    tile = _choose_tile(n)
    grid = pl.cdiv(n, tile)
    n_pad = grid * tile
    # Single lax.pad into the lane-dense (1, n_pad) layout (no zeros+scatter).
    xt = jnp.pad(x.reshape(1, n).astype(jnp.float32), ((0, 0), (0, n_pad - n)))
    out = pl.pallas_call(
        mlp_kernel,
        out_shape=jax.ShapeDtypeStruct((1, n_pad), jnp.float32),
        grid=(grid,),
        in_specs=[
            pl.BlockSpec((PROWS, PCOLS), lambda i: (0, 0)),   # params: resident
            pl.BlockSpec((1, tile), lambda i: (0, i)),        # x lane tile
        ],
        out_specs=pl.BlockSpec((1, tile), lambda i: (0, i)),
        compiler_params=pltpu.CompilerParams(
            dimension_semantics=("parallel",)),
    )(slab, xt)
    return out[0, :n].reshape(n, 1)


def init_linear(key, fan_in, fan_out):
    # Deterministic init mirroring nn.Linear's uniform(-1/sqrt(fan_in), +..).
    kw, kb = jax.random.split(key)
    bound = 1.0 / math.sqrt(fan_in)
    w = jax.random.uniform(kw, (fan_out, fan_in), jnp.float32, -bound, bound)
    b = jax.random.uniform(kb, (fan_out,), jnp.float32, -bound, bound)
    return w, b


def init_params(key):
    k1, k2, k3 = jax.random.split(key, 3)
    w1, b1 = init_linear(k1, 1, 8)
    w2, b2 = init_linear(k2, 8, 16)
    w3, b3 = init_linear(k3, 16, 1)
    return (w1, b1, w2, b2, w3, b3)


def mlp_reference(x, params):
    w1, b1, w2, b2, w3, b3 = params
    h1 = jnp.maximum(x @ w1.T + b1, 0.0)
    h2 = jnp.maximum(h1 @ w2.T + b2, 0.0)
    return h2 @ w3.T + b3


if __name__ == "__main__":
    key = jax.random.PRNGKey(0)
    kp, kx = jax.random.split(key)
    params = init_params(kp)
    slab = pack_params(params)

    # Input like `u` in the original script: 100 scalars, shape (N, 1).
    n = 100
    x = jax.random.normal(kx, (n, 1), jnp.float32) * 0.008
    out = jax.block_until_ready(mlp_forward(x, slab))
    ref = mlp_reference(x, params)
    assert out.shape == (n, 1)
    assert jnp.allclose(out, ref, atol=1e-5), "mismatch vs reference (n=100)"

    # Also exercise the multi-tile (grid > 1, both v7x cores) path once.
    nb = 20000
    xb = jax.random.normal(jax.random.PRNGKey(1), (nb, 1), jnp.float32) * 0.008
    outb = jax.block_until_ready(mlp_forward(xb, slab))
    refb = mlp_reference(xb, params)
    assert jnp.allclose(outb, refb, atol=1e-5), "mismatch vs reference (large n)"

    print("KERNEL_OK")
</pallas_src>

<mosaic_0001>
module attributes {stable_mosaic.version = 11 : i64} {
  func.func @mlp_kernel(%arg0: i32, %arg1: memref<72x128xf32, #tpu.memory_space<vmem>>, %arg2: memref<1x128xf32, #tpu.memory_space<vmem>>, %arg3: memref<1x128xf32, #tpu.memory_space<vmem>>) attributes {dimension_semantics = [#tpu.dimension_semantics<parallel>], iteration_bounds = array<i64: 1>, scalar_prefetch = 0 : i64, scratch_operands = 0 : i64, tpu.core_type = #tpu.core_type<tc>, window_params = [{pipeline_mode = #tpu.pipeline_mode<synchronous>, transform_indices = @transform_0, window_bounds = array<i64: 72, 128>}, {transform_indices = @transform_1, window_bounds = array<i64: 1, 128>}, {transform_indices = @transform_2, window_bounds = array<i64: 1, 128>}]} {
    %c0 = arith.constant 0 : index
    %c0_0 = arith.constant 0 : index
    %0 = vector.load %arg2[%c0, %c0_0] : memref<1x128xf32, #tpu.memory_space<vmem>>, vector<1x128xf32>
    %c0_1 = arith.constant 0 : index
    %c0_2 = arith.constant 0 : index
    %1 = vector.load %arg1[%c0_1, %c0_2] : memref<72x128xf32, #tpu.memory_space<vmem>>, vector<8x128xf32>
    %c8 = arith.constant 8 : index
    %c0_3 = arith.constant 0 : index
    %2 = vector.load %arg1[%c8, %c0_3] : memref<72x128xf32, #tpu.memory_space<vmem>>, vector<8x128xf32>
    %c16 = arith.constant 16 : index
    %c0_4 = arith.constant 0 : index
    %3 = vector.load %arg1[%c16, %c0_4] : memref<72x128xf32, #tpu.memory_space<vmem>>, vector<16x8xf32>
    %c32 = arith.constant 32 : index
    %c0_5 = arith.constant 0 : index
    %4 = vector.load %arg1[%c32, %c0_5] : memref<72x128xf32, #tpu.memory_space<vmem>>, vector<16x128xf32>
    %c48 = arith.constant 48 : index
    %c0_6 = arith.constant 0 : index
    %5 = vector.load %arg1[%c48, %c0_6] : memref<72x128xf32, #tpu.memory_space<vmem>>, vector<16x128xf32>
    %c64 = arith.constant 64 : index
    %c0_7 = arith.constant 0 : index
    %6 = vector.load %arg1[%c64, %c0_7] : memref<72x128xf32, #tpu.memory_space<vmem>>, vector<1x128xf32>
    %7 = vector.broadcast %0 : vector<1x128xf32> to vector<8x128xf32>
    %8 = arith.mulf %1, %7 : vector<8x128xf32>
    %9 = arith.addf %8, %2 : vector<8x128xf32>
    %cst = arith.constant 0.000000e+00 : f32
    %10 = vector.broadcast %cst : f32 to vector<8x128xf32>
    %11 = arith.maximumf %9, %10 : vector<8x128xf32>
    %cst_8 = arith.constant dense<0.000000e+00> : vector<16x128xf32>
    %12 = tpu.matmul %3, %11, %cst_8 {dimension_numbers = #tpu.dot_dimension_numbers<[1], [0], [0], [1], [0, 0, 1, 1], [], []>} : vector<16x8xf32>, vector<8x128xf32>, vector<16x128xf32> -> vector<16x128xf32>
    %13 = arith.addf %12, %4 : vector<16x128xf32>
    %cst_9 = arith.constant 0.000000e+00 : f32
    %14 = vector.broadcast %cst_9 : f32 to vector<16x128xf32>
    %15 = arith.maximumf %13, %14 : vector<16x128xf32>
    %16 = arith.mulf %5, %15 : vector<16x128xf32>
    %cst_10 = arith.constant dense<0.000000e+00> : vector<128xf32>
    %17 = vector.multi_reduction <add>, %16, %cst_10 [0] : vector<16x128xf32> to vector<128xf32>
    %18 = vector.shape_cast %17 : vector<128xf32> to vector<1x128xf32>
    %19 = arith.addf %18, %6 : vector<1x128xf32>
    %c0_11 = arith.constant 0 : index
    %c0_12 = arith.constant 0 : index
    %20 = vector.load %arg3[%c0_11, %c0_12] : memref<1x128xf32, #tpu.memory_space<vmem>>, vector<1x128xf32>
    tpu.vector_store %arg3[%c0_11, %c0_12], %19 {strides = array<i32>} : memref<1x128xf32, #tpu.memory_space<vmem>>, vector<1x128xf32>,
    return
  }
  func.func @transform_0(%arg0: i32) -> (i32, i32) {
    %c0_i32 = arith.constant 0 : i32
    %c0_i32_0 = arith.constant 0 : i32
    %c0_i32_1 = arith.constant 0 : i32
    return %c0_i32, %c0_i32_0 : i32, i32
  }
  func.func @transform_1(%arg0: i32) -> (i32, i32) {
    %c0_i32 = arith.constant 0 : i32
    %c0_i32_0 = arith.constant 0 : i32
    return %c0_i32, %arg0 : i32, i32
  }
  func.func @transform_2(%arg0: i32) -> (i32, i32) {
    %c0_i32 = arith.constant 0 : i32
    %c0_i32_0 = arith.constant 0 : i32
    return %c0_i32, %arg0 : i32, i32
  }
}

</mosaic_0001>

<bundles_post_ra>
// kernel: mlp_forward.1
= control target key start
LH: loop header
LB: loop body
LE: loop exit
PB: predicated region body
PF: predicated region fallthrough
CT: control target
= control target key end

     0   :  { %7 = vsyncpa [#allocation3], 0  ;;  %s180_s9 = smov [#allocation2]   ;;  %s207_s0 = inlined_call_operand.hbm [shape: f32[72,128], index: 0, kind: input, shape index: {}]   ;;  %s208_s1 = inlined_call_operand.vmem [shape: f32[1,128], index: 1, kind: input, shape index: {}]   ;;  %s209_s2 = inlined_call_operand.vmem [shape: f32[1,128], index: 2, kind: output, shape index: {}]  }
   0x1   :  { %s13_s10 = sshll.u32 %s180_s9, 4  ;;  %s14_s10 = int_to_ptr.vmem [resolvable:$true] %s13_s10 }
   0x2   :  { %s166_s11 = scalar_lea.vmem %s14_s10, 1152  ;;  %p171_p1 = scmp.lt.s32.totalorder %s14_s10, %s14_s10 }
   0x3   :  { %p167_p0 = scmp.ne.s32.totalorder %s14_s10, %s166_s11  ;;  %p172_p2 = scmp.lt.s32.totalorder %s166_s11, %s166_s11 }
   0x5   :  { %p173_p3 = por %p172_p2, %p171_p1 }
   0x7   :  { %p174_p4 = pnand %p173_p3, %p167_p0 }
   0x9   :  { %177 = shalt.err (!%p174_p4)
}
   0xa   :  { %s181_s12 = smov 128   ;;  %s182_s13 = smov 8  }
   0xb   :  { %19 = dma.hbm_to_vmem [thread:$0]  %s207_s0, 1152, %s14_s10, [#allocation3], %s181_s12, %s181_s12, %s182_s13  }
   0xc   :  { %178 = dma.done.wait [#allocation3], 1152  }
   0xd   :  { %179 = vsyncadd [#allocation3], 4294966144  ;;  %vm44_vm0 = vcmask 64512   ;;  %v144_v0 = vld [vmem:[%s208_s1] ss:$0 sm:$0xff]  ;;  %v27_v2 = vld [vmem:[#allocation2 + $0x8] sm:$0xff] }
   0xe   :  { %v26_v1 = vld [vmem:[#allocation2] sm:$0xff]  ;;  %v28_v4 = vld [vmem:[#allocation2 + $0x10] sm:$0xff]  ;;  %v29_v7 = vld [vmem:[#allocation2 + $0x18] sm:$0xff] }
   0xf   :  { %v41_v3 = vmul.f32 %v144_v0, %v26_v1  ;;  %152 = vmatprep.mubr.msk.f32.mxu0 %vm44_vm0, %v28_v4  ;;  %v31_v8 = vld [vmem:[#allocation2 + $0x28] sm:$0xff]  ;;  %v30_v10 = vld [vmem:[#allocation2 + $0x20] sm:$0xff]  ;;  %v33_v15 = vld [vmem:[#allocation2 + $0x38] sm:$0xff] }
  0x10   :  { %v32_v16 = vld [vmem:[#allocation2 + $0x30] sm:$0xff]  ;;  %v34_v26 = vld [vmem:[#allocation2 + $0x40] sm:$0x1] }
  0x11   :  { %v42_v5 = vadd.f32 %v41_v3, %v27_v2 }
  0x13   :  { %v43_v6 = vmax.f32 %v42_v5, 0.0 }
  0x15   :  { %150 = vmatprep.subr.mxu0 %v43_v6 }
  0x16   :  { %151 = vmatpush3.msra.mxu0 %v43_v6 }
  0x17   :  { %153 = vmatmul.mubr.msk.f32.vlgmr.msra.gmra.mxu0 %vm44_vm0, %v29_v7 }
  0xd7   :  { %v154_v9 = vpop.f32.mrf.mxu0 }
  0xd8   :  { %v123_v11 = vadd.f32 %v154_v9, %v31_v8 }
  0xd9   :  { %v117_v12 = vpop.f32.mrf.mxu0 }
  0xda   :  { %v127_v13 = vmax.f32 %v123_v11, 0.0  ;;  %v118_v14 = vadd.f32 %v117_v12, %v30_v10 }
  0xdc   :  { %v126_v17 = vmax.f32 %v118_v14, 0.0  ;;  %v129_v18 = vmul.f32 %v127_v13, %v33_v15 }
  0xde   :  { %v128_v19 = vmul.f32 %v126_v17, %v32_v16 }
  0xe0   :  { %v130_v20 = vadd.f32 %v129_v18, %v128_v19 }
  0xe2   :  { %v131_v21 = vrot.slane %v130_v20, 4 }
  0xe4   :  { %v132_v22 = vadd.f32 %v131_v21, %v130_v20 }
  0xe6   :  { %v133_v23 = vrot.slane %v132_v22, 2 }
  0xe8   :  { %v134_v24 = vadd.f32 %v133_v23, %v132_v22 }
  0xea   :  { %v135_v25 = vrot.slane %v134_v24, 1 }
  0xec   :  { %v136_v27 = vadd.f32 %v135_v25, %v134_v24 }
  0xee   :  { %v137_v28 = vadd.f32 %v136_v27, %v34_v26 }
  0xf0   :  { %138 = vst [vmem:[%s209_s2] sm:$0x1] %v137_v28 }
  0xf1   :  { %143 = vsyncpa [#allocation3], 1 }

</bundles_post_ra>
